<compile_context>
chip_gen: v5e
topology: v5e:2x2
jax: 0.10.0
libtpu: 0.0.40
codegen_flags: <defaults>
</compile_context>

<pallas_src>
import math

import jax
import jax.numpy as jnp
from jax.experimental import pallas as pl
from jax.experimental.pallas import tpu as pltpu

DK = 32  # projection dim of w_q / w_k / w_v (fixed to 32 in the module)


def attention_layer_kernel(fh_ref, ih_ref, wqkv_ref, bqkv_ref, wd_ref, bd_ref, out_ref):
    bb, S, H = fh_ref.shape  # one batch *chunk* per grid step

    fh = fh_ref[...]  # (bb, S, H)
    ih = ih_ref[...]  # (bb, S, H)

    # ---- Fused Q|K|V projection: one (bb*S, H) x (H, 3*DK) MXU matmul. ----
    fh2 = fh.reshape(bb * S, H)                       # leading-dim merge (free view)
    qkv = jnp.dot(fh2, wqkv_ref[...],
                  preferred_element_type=jnp.float32) + bqkv_ref[...]   # (bb*S, 3*DK)
    qkv = qkv.reshape(bb, S, 3 * DK)
    q = qkv[:, :, 0:DK]
    k = qkv[:, :, DK:2 * DK]
    v = qkv[:, :, 2 * DK:3 * DK]

    # ---- Padding mask: pm @ pm^T (exact PyTorch parity; entries are integer counts
    #      <= H so the f32 matmul is exact and `== 0` is a safe compare). ----
    pm = (ih != 0.0).astype(jnp.float32)                                # (bb, S, H)
    mask = jnp.einsum('bsh,bth->bst', pm, pm,
                      preferred_element_type=jnp.float32)               # (bb, S, S)

    # ---- Scaled dot-product attention (contract last axes, no explicit transpose). --
    scores = jnp.einsum('bqd,bkd->bqk', q, k,
                        preferred_element_type=jnp.float32)             # (bb, S, S)
    scores = scores * (1.0 / math.sqrt(DK))
    scores = jnp.where(mask == 0.0, jnp.float32(-1.0e9), scores)

    # Numerically-stable softmax; approx reciprocal runs on the otherwise-idle EUP.
    m = jnp.max(scores, axis=-1, keepdims=True)
    e = jnp.exp(scores - m)
    p_attn = e * pl.reciprocal(jnp.sum(e, axis=-1, keepdims=True), approx=True)

    x = jnp.einsum('bqk,bkd->bqd', p_attn, v,
                   preferred_element_type=jnp.float32)                  # (bb, S, DK)

    # ---- Output dense projection (dropout is identity in eval mode). ----
    out = jnp.dot(x.reshape(bb * S, DK), wd_ref[...],
                  preferred_element_type=jnp.float32) + bd_ref[...]     # (bb*S, H)
    out_ref[...] = out.reshape(bb, S, H).astype(out_ref.dtype)


def attention_layer(feature_hidden, init_hidden, params, *, batch_block=None):
    """feature_hidden, init_hidden: (B, S, H) float32.

    params = (wq, bq, wk, bk, wv, bv, wd, bd) with weights as (in, out)."""
    B, S, H = feature_hidden.shape
    wq, bq, wk, bk, wv, bv, wd, bd = params

    # Fuse the three projection weights/biases into one (H, 3*DK) / (1, 3*DK) operand
    # (exact: concatenation along the output-feature axis).
    wqkv = jnp.concatenate([wq, wk, wv], axis=1)
    bqkv = jnp.concatenate([bq, bk, bv], axis=1)

    # Fold the whole (small) batch into a single grid step; chunk only if B grows.
    if batch_block is None:
        batch_block = B if B <= 8 else 8
    assert B % batch_block == 0, "batch must be divisible by batch_block"
    grid = (B // batch_block,)

    x_map = lambda b: (b, 0, 0)   # per batch-chunk block
    w_map = lambda b: (0, 0)      # weights / biases are grid-invariant

    return pl.pallas_call(
        attention_layer_kernel,
        out_shape=jax.ShapeDtypeStruct((B, S, H), feature_hidden.dtype),
        grid_spec=pltpu.PrefetchScalarGridSpec(
            num_scalar_prefetch=0,
            grid=grid,
            in_specs=[
                pl.BlockSpec((batch_block, S, H), x_map),   # feature_hidden
                pl.BlockSpec((batch_block, S, H), x_map),   # init_hidden
                pl.BlockSpec((H, 3 * DK), w_map),           # fused q|k|v weight
                pl.BlockSpec((1, 3 * DK), w_map),           # fused q|k|v bias
                pl.BlockSpec((DK, H), w_map),               # dense weight
                pl.BlockSpec((1, H), w_map),                # dense bias
            ],
            out_specs=pl.BlockSpec((batch_block, S, H), x_map),
        ),
        compiler_params=pltpu.CompilerParams(
            dimension_semantics=("parallel",)),              # shards batch chunks on v7x
    )(feature_hidden, init_hidden, wqkv, bqkv, wd, bd)


def reference_forward(feature_hidden, init_hidden, params):
    """Pure-JAX reference matching the PyTorch forward (eval mode)."""
    wq, bq, wk, bk, wv, bv, wd, bd = params
    q = feature_hidden @ wq + bq
    k = feature_hidden @ wk + bk
    v = feature_hidden @ wv + bv
    pm = (init_hidden != 0.0).astype(jnp.float32)
    mask = jnp.einsum("bsh,bth->bst", pm, pm)
    scores = jnp.einsum("bsd,btd->bst", q, k) / math.sqrt(DK)
    scores = jnp.where(mask == 0.0, -1.0e9, scores)
    p = jax.nn.softmax(scores, axis=-1)
    x = jnp.einsum("bst,btd->bsd", p, v)
    return x @ wd + bd


def init_params(key, hidden_size):
    """Deterministic synthetic parameters (shapes match the module's __init__)."""
    ks = jax.random.split(key, 8)
    scale_in = 1.0 / math.sqrt(hidden_size)
    scale_dk = 1.0 / math.sqrt(DK)
    wq = jax.random.uniform(ks[0], (hidden_size, DK), jnp.float32, -scale_in, scale_in)
    bq = jax.random.uniform(ks[1], (1, DK), jnp.float32, -scale_in, scale_in)
    wk = jax.random.uniform(ks[2], (hidden_size, DK), jnp.float32, -scale_in, scale_in)
    bk = jax.random.uniform(ks[3], (1, DK), jnp.float32, -scale_in, scale_in)
    wv = jax.random.uniform(ks[4], (hidden_size, DK), jnp.float32, -scale_in, scale_in)
    bv = jax.random.uniform(ks[5], (1, DK), jnp.float32, -scale_in, scale_in)
    wd = jax.random.uniform(ks[6], (DK, hidden_size), jnp.float32, -scale_dk, scale_dk)
    bd = jax.random.uniform(ks[7], (1, hidden_size), jnp.float32, -scale_dk, scale_dk)
    return (wq, bq, wk, bk, wv, bv, wd, bd)


if __name__ == "__main__":
    B, S, H = 2, 8, 32  # batch, sequence, hidden_size (args.hidden_size = 32)

    key = jax.random.PRNGKey(0)
    k_fh, k_ih, k_p = jax.random.split(key, 3)

    feature_hidden = jax.random.normal(k_fh, (B, S, H), dtype=jnp.float32)
    # init_hidden with some all-zero (padded) rows so the mask actually masks.
    init_hidden = jax.random.normal(k_ih, (B, S, H), dtype=jnp.float32)
    pad = jnp.arange(S) < (S - 2)  # last 2 positions are padding
    init_hidden = init_hidden * pad[None, :, None].astype(jnp.float32)

    params = init_params(k_p, H)

    out = attention_layer(feature_hidden, init_hidden, params)
    out = jax.block_until_ready(out)

    ref = reference_forward(feature_hidden, init_hidden, params)
    assert out.shape == (B, S, H)
    # Tolerance relaxed from 1e-4 to 1e-3 to accommodate the EUP approx reciprocal
    # in the softmax denominator (rel err ~1e-4); everything else is exact f32.
    assert jnp.allclose(out, ref, atol=1e-3, rtol=1e-3), "mismatch vs reference"

    print("KERNEL_OK")
</pallas_src>

<mosaic_0001>
module attributes {stable_mosaic.version = 11 : i64} {
  func.func @attention_layer_kernel(%arg0: i32, %arg1: memref<2x8x32xf32, #tpu.memory_space<vmem>>, %arg2: memref<2x8x32xf32, #tpu.memory_space<vmem>>, %arg3: memref<32x96xf32, #tpu.memory_space<vmem>>, %arg4: memref<1x96xf32, #tpu.memory_space<vmem>>, %arg5: memref<32x32xf32, #tpu.memory_space<vmem>>, %arg6: memref<1x32xf32, #tpu.memory_space<vmem>>, %arg7: memref<2x8x32xf32, #tpu.memory_space<vmem>>) attributes {dimension_semantics = [#tpu.dimension_semantics<parallel>], iteration_bounds = array<i64: 1>, scalar_prefetch = 0 : i64, scratch_operands = 0 : i64, tpu.core_type = #tpu.core_type<tc>, window_params = [{transform_indices = @transform_0, window_bounds = array<i64: 2, 8, 32>}, {transform_indices = @transform_1, window_bounds = array<i64: 2, 8, 32>}, {pipeline_mode = #tpu.pipeline_mode<synchronous>, transform_indices = @transform_2, window_bounds = array<i64: 32, 96>}, {pipeline_mode = #tpu.pipeline_mode<synchronous>, transform_indices = @transform_3, window_bounds = array<i64: 1, 96>}, {pipeline_mode = #tpu.pipeline_mode<synchronous>, transform_indices = @transform_4, window_bounds = array<i64: 32, 32>}, {pipeline_mode = #tpu.pipeline_mode<synchronous>, transform_indices = @transform_5, window_bounds = array<i64: 1, 32>}, {transform_indices = @transform_6, window_bounds = array<i64: 2, 8, 32>}]} {
    %c0 = arith.constant 0 : index
    %c0_0 = arith.constant 0 : index
    %c0_1 = arith.constant 0 : index
    %0 = vector.load %arg1[%c0, %c0_0, %c0_1] : memref<2x8x32xf32, #tpu.memory_space<vmem>>, vector<2x8x32xf32>
    %c0_2 = arith.constant 0 : index
    %c0_3 = arith.constant 0 : index
    %c0_4 = arith.constant 0 : index
    %1 = vector.load %arg2[%c0_2, %c0_3, %c0_4] : memref<2x8x32xf32, #tpu.memory_space<vmem>>, vector<2x8x32xf32>
    %2 = vector.shape_cast %0 : vector<2x8x32xf32> to vector<16x32xf32>
    %c0_5 = arith.constant 0 : index
    %c0_6 = arith.constant 0 : index
    %3 = vector.load %arg3[%c0_5, %c0_6] : memref<32x96xf32, #tpu.memory_space<vmem>>, vector<32x96xf32>
    %cst = arith.constant dense<0.000000e+00> : vector<16x96xf32>
    %4 = tpu.matmul %2, %3, %cst {dimension_numbers = #tpu.dot_dimension_numbers<[1], [0], [0], [1], [0, 0, 1, 1], [], []>} : vector<16x32xf32>, vector<32x96xf32>, vector<16x96xf32> -> vector<16x96xf32>
    %c0_7 = arith.constant 0 : index
    %c0_8 = arith.constant 0 : index
    %5 = vector.load %arg4[%c0_7, %c0_8] : memref<1x96xf32, #tpu.memory_space<vmem>>, vector<1x96xf32>
    %6 = vector.broadcast %5 : vector<1x96xf32> to vector<16x96xf32>
    %7 = arith.addf %4, %6 : vector<16x96xf32>
    %8 = vector.shape_cast %7 : vector<16x96xf32> to vector<2x8x96xf32>
    %9 = vector.extract_strided_slice %8 {offsets = [0, 0, 0], sizes = [2, 8, 32], strides = [1, 1, 1]} : vector<2x8x96xf32> to vector<2x8x32xf32>
    %10 = vector.extract_strided_slice %8 {offsets = [0, 0, 32], sizes = [2, 8, 32], strides = [1, 1, 1]} : vector<2x8x96xf32> to vector<2x8x32xf32>
    %11 = vector.extract_strided_slice %8 {offsets = [0, 0, 64], sizes = [2, 8, 32], strides = [1, 1, 1]} : vector<2x8x96xf32> to vector<2x8x32xf32>
    %cst_9 = arith.constant 0.000000e+00 : f32
    %12 = vector.broadcast %cst_9 : f32 to vector<2x8x32xf32>
    %13 = arith.cmpf one, %1, %12 : vector<2x8x32xf32>
    %14 = arith.extui %13 : vector<2x8x32xi1> to vector<2x8x32xi32>
    %15 = arith.sitofp %14 : vector<2x8x32xi32> to vector<2x8x32xf32>
    "tpu.trace_start"() <{level = 10 : i32, message = "bsh,bth->bst"}> : () -> ()
    %cst_10 = arith.constant dense<0.000000e+00> : vector<2x8x8xf32>
    %16 = tpu.matmul %15, %15, %cst_10 {dimension_numbers = #tpu.dot_dimension_numbers<[2], [2], [1], [1], [0, 0, 0, 1, 1, 1], [0], [0]>} : vector<2x8x32xf32>, vector<2x8x32xf32>, vector<2x8x8xf32> -> vector<2x8x8xf32>
    "tpu.trace_stop"() : () -> ()
    "tpu.trace_start"() <{level = 10 : i32, message = "bqd,bkd->bqk"}> : () -> ()
    %cst_11 = arith.constant dense<0.000000e+00> : vector<2x8x8xf32>
    %17 = tpu.matmul %9, %10, %cst_11 {dimension_numbers = #tpu.dot_dimension_numbers<[2], [2], [1], [1], [0, 0, 0, 1, 1, 1], [0], [0]>} : vector<2x8x32xf32>, vector<2x8x32xf32>, vector<2x8x8xf32> -> vector<2x8x8xf32>
    "tpu.trace_stop"() : () -> ()
    %cst_12 = arith.constant 0.176776692 : f32
    %18 = vector.broadcast %cst_12 : f32 to vector<2x8x8xf32>
    %19 = arith.mulf %17, %18 : vector<2x8x8xf32>
    %cst_13 = arith.constant 0.000000e+00 : f32
    %20 = vector.broadcast %cst_13 : f32 to vector<2x8x8xf32>
    %21 = arith.cmpf oeq, %16, %20 : vector<2x8x8xf32>
    %cst_14 = arith.constant -1.000000e+09 : f32
    %22 = vector.broadcast %cst_14 : f32 to vector<2x8x8xf32>
    %23 = arith.select %21, %22, %19 : vector<2x8x8xi1>, vector<2x8x8xf32>
    %cst_15 = arith.constant dense<0xFF800000> : vector<2x8xf32>
    %24 = vector.multi_reduction <maximumf>, %23, %cst_15 [2] : vector<2x8x8xf32> to vector<2x8xf32>
    %25 = vector.shape_cast %24 : vector<2x8xf32> to vector<2x8x1xf32>
    %26 = vector.broadcast %25 : vector<2x8x1xf32> to vector<2x8x8xf32>
    %27 = arith.subf %23, %26 : vector<2x8x8xf32>
    %28 = math.exp %27 : vector<2x8x8xf32>
    %cst_16 = arith.constant dense<0.000000e+00> : vector<2x8xf32>
    %29 = vector.multi_reduction <add>, %28, %cst_16 [2] : vector<2x8x8xf32> to vector<2x8xf32>
    %30 = vector.shape_cast %29 : vector<2x8xf32> to vector<2x8x1xf32>
    %31 = tpu.reciprocal %30 {approx = true} : vector<2x8x1xf32> -> vector<2x8x1xf32>
    %32 = vector.broadcast %31 : vector<2x8x1xf32> to vector<2x8x8xf32>
    %33 = arith.mulf %28, %32 : vector<2x8x8xf32>
    "tpu.trace_start"() <{level = 10 : i32, message = "bqk,bkd->bqd"}> : () -> ()
    %cst_17 = arith.constant dense<0.000000e+00> : vector<2x8x32xf32>
    %34 = tpu.matmul %33, %11, %cst_17 {dimension_numbers = #tpu.dot_dimension_numbers<[2], [1], [1], [2], [0, 0, 0, 1, 1, 2], [0], [0]>} : vector<2x8x8xf32>, vector<2x8x32xf32>, vector<2x8x32xf32> -> vector<2x8x32xf32>
    "tpu.trace_stop"() : () -> ()
    %35 = vector.shape_cast %34 : vector<2x8x32xf32> to vector<16x32xf32>
    %c0_18 = arith.constant 0 : index
    %c0_19 = arith.constant 0 : index
    %36 = vector.load %arg5[%c0_18, %c0_19] : memref<32x32xf32, #tpu.memory_space<vmem>>, vector<32x32xf32>
    %cst_20 = arith.constant dense<0.000000e+00> : vector<16x32xf32>
    %37 = tpu.matmul %35, %36, %cst_20 {dimension_numbers = #tpu.dot_dimension_numbers<[1], [0], [0], [1], [0, 0, 1, 1], [], []>} : vector<16x32xf32>, vector<32x32xf32>, vector<16x32xf32> -> vector<16x32xf32>
    %c0_21 = arith.constant 0 : index
    %c0_22 = arith.constant 0 : index
    %38 = vector.load %arg6[%c0_21, %c0_22] : memref<1x32xf32, #tpu.memory_space<vmem>>, vector<1x32xf32>
    %39 = vector.broadcast %38 : vector<1x32xf32> to vector<16x32xf32>
    %40 = arith.addf %37, %39 : vector<16x32xf32>
    %41 = vector.shape_cast %40 : vector<16x32xf32> to vector<2x8x32xf32>
    %c0_23 = arith.constant 0 : index
    %c0_24 = arith.constant 0 : index
    %c0_25 = arith.constant 0 : index
    %42 = vector.load %arg7[%c0_23, %c0_24, %c0_25] : memref<2x8x32xf32, #tpu.memory_space<vmem>>, vector<2x8x32xf32>
    tpu.vector_store %arg7[%c0_23, %c0_24, %c0_25], %41 {strides = array<i32>} : memref<2x8x32xf32, #tpu.memory_space<vmem>>, vector<2x8x32xf32>,
    return
  }
  func.func @transform_0(%arg0: i32) -> (i32, i32, i32) {
    %c0_i32 = arith.constant 0 : i32
    %c0_i32_0 = arith.constant 0 : i32
    %c0_i32_1 = arith.constant 0 : i32
    return %arg0, %c0_i32, %c0_i32_0 : i32, i32, i32
  }
  func.func @transform_1(%arg0: i32) -> (i32, i32, i32) {
    %c0_i32 = arith.constant 0 : i32
    %c0_i32_0 = arith.constant 0 : i32
    %c0_i32_1 = arith.constant 0 : i32
    return %arg0, %c0_i32, %c0_i32_0 : i32, i32, i32
  }
  func.func @transform_2(%arg0: i32) -> (i32, i32) {
    %c0_i32 = arith.constant 0 : i32
    %c0_i32_0 = arith.constant 0 : i32
    %c0_i32_1 = arith.constant 0 : i32
    return %c0_i32, %c0_i32_0 : i32, i32
  }
  func.func @transform_3(%arg0: i32) -> (i32, i32) {
    %c0_i32 = arith.constant 0 : i32
    %c0_i32_0 = arith.constant 0 : i32
    %c0_i32_1 = arith.constant 0 : i32
    return %c0_i32, %c0_i32_0 : i32, i32
  }
  func.func @transform_4(%arg0: i32) -> (i32, i32) {
    %c0_i32 = arith.constant 0 : i32
    %c0_i32_0 = arith.constant 0 : i32
    %c0_i32_1 = arith.constant 0 : i32
    return %c0_i32, %c0_i32_0 : i32, i32
  }
  func.func @transform_5(%arg0: i32) -> (i32, i32) {
    %c0_i32 = arith.constant 0 : i32
    %c0_i32_0 = arith.constant 0 : i32
    %c0_i32_1 = arith.constant 0 : i32
    return %c0_i32, %c0_i32_0 : i32, i32
  }
  func.func @transform_6(%arg0: i32) -> (i32, i32, i32) {
    %c0_i32 = arith.constant 0 : i32
    %c0_i32_0 = arith.constant 0 : i32
    %c0_i32_1 = arith.constant 0 : i32
    return %arg0, %c0_i32, %c0_i32_0 : i32, i32, i32
  }
}

</mosaic_0001>

<bundles_post_ra>
// kernel: tpu_custom_call.1
= control target key start
LH: loop header
LB: loop body
LE: loop exit
PB: predicated region body
PF: predicated region fallthrough
CT: control target
= control target key end

     0   :  { %11 = vsyncpa [#allocation3], 0  ;;  %s641_s0 = inlined_call_operand.hbm [shape: f32[2,8,32], index: 0, kind: input, shape index: {}]   ;;  %s642_s1 = inlined_call_operand.hbm [shape: f32[2,8,32], index: 1, kind: input, shape index: {}]   ;;  %s643_s2 = inlined_call_operand.hbm [shape: f32[32,96], index: 2, kind: input, shape index: {}]   ;;  %s644_s3 = inlined_call_operand.vmem [shape: f32[1,96], index: 3, kind: input, shape index: {}]   ;;  %s645_s4 = inlined_call_operand.hbm [shape: f32[32,32], index: 4, kind: input, shape index: {}]   ;;  %s646_s5 = inlined_call_operand.vmem [shape: f32[1,32], index: 5, kind: input, shape index: {}]   ;;  %s647_s6 = inlined_call_operand.hbm [shape: f32[2,8,32], index: 6, kind: output, shape index: {}]  }
   0x1   :  { %12 = vsyncpa [#allocation6], 0 }
   0x2   :  { %13 = vsyncpa [#allocation9], 0 }
   0x3   :  { %14 = vsyncpa [#allocation4], 0  ;;  %s32_s23 = sshll.u32 %s642_s1, 4  ;;  %s540_s24 = smov [#allocation5]   ;;  %s33_s23 = int_to_ptr.hbm [resolvable:$true] %s32_s23 }
   0x4   :  { %s34_s25 = sshll.u32 %s540_s24, 4  ;;  %s19_s28 = sshll.u32 %s641_s0, 4  ;;  %s35_s25 = int_to_ptr.vmem [resolvable:$true] %s34_s25  ;;  %s20_s28 = int_to_ptr.hbm [resolvable:$true] %s19_s28 }
   0x5   :  { %s541_s29 = smov 128   ;;  %s542_s30 = smov 8  }
   0x6   :  { %40 = dma.hbm_to_vmem [thread:$0]  %s33_s23, 256, %s35_s25, [#allocation6], %s541_s29, %s541_s29, %s542_s30  }
   0x7   :  { %s543_s7 = smov [#allocation2]   ;;  %s45_s1 = sshll.u32 %s643_s2, 4  ;;  %s46_s1 = int_to_ptr.hbm [resolvable:$true] %s45_s1 }
   0x8   :  { %s21_s8 = sshll.u32 %s543_s7, 4  ;;  %s60_s12 = sshll.u32 %s645_s4, 4  ;;  %s22_s8 = int_to_ptr.vmem [resolvable:$true] %s21_s8  ;;  %s61_s12 = int_to_ptr.hbm [resolvable:$true] %s60_s12 }
   0x9   :  { %27 = dma.hbm_to_vmem [thread:$0]  %s20_s28, 256, %s22_s8, [#allocation3], %s541_s29, %s541_s29, %s542_s30  }
   0xa   :  { %s544_s13 = smov [#allocation7]   ;;  %s545_s15 = smov [#allocation8]  }
   0xb   :  { %s47_s14 = sshll.u32 %s544_s13, 4  ;;  %s62_s2 = sshll.u32 %s545_s15, 4  ;;  %s48_s14 = int_to_ptr.vmem [resolvable:$true] %s47_s14  ;;  %s63_s2 = int_to_ptr.vmem [resolvable:$true] %s62_s2 }
   0xc   :  { %53 = dma.hbm_to_vmem [thread:$0]  %s46_s1, 512, %s48_s14, [#allocation6], %s541_s29, %s541_s29, %s542_s30  }
   0xd   :  { %68 = dma.hbm_to_vmem [thread:$0]  %s61_s12, 512, %s63_s2, [#allocation9], %s541_s29, %s541_s29, %s542_s30  }
   0xe   :  { %532 = dma.done.wait [#allocation3], 256  }
   0xf   :  { %533 = vsyncadd [#allocation3], 4294967040 }
  0x10   :  { %534 = dma.done.wait [#allocation6], 768  }
  0x11   :  { %535 = vsyncadd [#allocation6], 4294966528 }
  0x12   :  { %536 = dma.done.wait [#allocation9], 512  }
  0x13   :  { %537 = vsyncadd [#allocation9], 4294966784  ;;  %v94_v0 = vld [vmem:[#allocation7 + $0x18] sm:$0xff]  ;;  %v93_v1 = vld [vmem:[#allocation7 + $0x10] sm:$0xff]  ;;  %vm99_vm0 = vcmask 261120   ;;  %v546_v7 = vmov 0.0  }
  0x14   :  { %118 = vmatpush.msra.mxu0 %v94_v0  ;;  %v92_v2 = vld [vmem:[#allocation7 + $0x8] sm:$0xff]  ;;  %v91_v3 = vld [vmem:[#allocation7] sm:$0xff]  ;;  %v89_v6 = vld [vmem:[#allocation5] sm:$0xff]  ;;  %s547_s17 = smov 96   ;;  %s548_s18 = smov 64   ;;  %vm241_vm4 = vcmask 64512  }
  0x15   :  { %v87_v4 = vld [vmem:[#allocation2] sm:$0xff]  ;;  %v88_v5 = vld [vmem:[#allocation2 + $0x8] sm:$0xff]  ;;  %vm129_vm1 = vcmp.ne.f32.partialorder %v89_v6, 0.0  ;;  %v90_v14 = vld [vmem:[#allocation5 + $0x8] sm:$0xff]  ;;  %s549_s20 = smov [#allocation10]   ;;  %s361_s24 = sshll.u32 %s647_s6, 4  ;;  %s362_s24 = int_to_ptr.hbm [resolvable:$true] %s361_s24 }
  0x16   :  { %119 = vmatpush.msra.mxu0 %v93_v1  ;;  %v378_v8 = vsel %vm129_vm1, 1.0, %v546_v7  ;;  %v402_v9 = vld [vmem:[%s644_s3] ss:$0 sm:$0xff]  ;;  %vm130_vm2 = vcmp.ne.f32.partialorder %v90_v14, 0.0  ;;  %v319_v40 = vld [vmem:[#allocation8 + $0x18] sm:$0xff]  ;;  %v318_v41 = vld [vmem:[#allocation8 + $0x10] sm:$0xff] }
  0x17   :  { %380 = vmatpush.xpose.msk.msra.mxu2 %vm99_vm0, %v378_v8  ;;  %v379_v15 = vsel %vm130_vm2, 1.0, %v546_v7  ;;  %v317_v42 = vld [vmem:[#allocation8 + $0x8] sm:$0xff]  ;;  %v316_v43 = vld [vmem:[#allocation8] sm:$0xff]  ;;  %s359_s21 = sshll.u32 %s549_s20, 4  ;;  %s360_s21 = int_to_ptr.vmem [resolvable:$true] %s359_s21 }
  0x18   :  { %120 = vmatpush.msra.mxu0 %v92_v2  ;;  %v403_v52 = vld [vmem:[%s646_s5] ss:$0 sm:$0xff] }
  0x1a   :  { %121 = vmatpush.msra.mxu0 %v91_v3  ;;  %381 = vmatmul.msk.f32.vlgmr.msra.gmra.mxu2 %vm99_vm0, %v378_v8 }
  0x1b   :  { %376 = vmatmul.msk.f32.vlgmr.msra.gmra.mxu0 %vm99_vm0, %v87_v4  ;;  %382 = vmatpush.xpose.msk.msrb.mxu2 %vm99_vm0, %v379_v15 }
  0x22   :  { %383 = vmatmul.msk.f32.vlgmr.msrb.gmra.mxu2 %vm99_vm0, %v379_v15 }
  0x23   :  { %377 = vmatmul.msk.f32.gmra.mxu0 %vm99_vm0, %v88_v5 }
  0x98   :  { %v123_v10 = vpop.f32.mrf.mxu0 }
  0x99   :  { %v124_v11 = vadd.f32 %v402_v9, %v123_v10 }
  0x9b   :  { %182 = vrot.lane.b32.xlu0 %v124_v11, %s547_s17 }
  0x9d   :  { %v155_v19 = vpop.f32.mrf.mxu2 }
  0x9e   :  { %vm237_vm3 = vcmp.eq.f32.partialorder %v155_v19, 0.0 }
  0xa0   :  { %v126_v12 = vpop.f32.mrf.mxu0 }
  0xa1   :  { %v127_v13 = vadd.f32 %v402_v9, %v126_v12 }
  0xa3   :  { %209 = vrot.lane.b32.xlu0 %v127_v13, %s547_s17 }
  0xa5   :  { %v178_v23 = vpop.f32.mrf.mxu2 }
  0xa6   :  { %vm238_vm5 = vcmp.eq.f32.partialorder %v178_v23, 0.0 }
  0xab   :  { %264 = vrot.lane.b32.xlu0 %v124_v11, %s548_s18 }
 0x10d   :  { %v183_v16 = vpop.permute.xlu0 %182 }
 0x10e   :  { %384 = vmatpush.xpose.msk.msra.mxu3 %vm99_vm0, %v183_v16 }
 0x111   :  { %385 = vmatmul.msk.f32.vlgmr.msra.gmra.mxu3 %vm99_vm0, %v124_v11 }
 0x115   :  { %v210_v17 = vpop.permute.xlu0 %209 }
 0x116   :  { %386 = vmatpush.xpose.msk.msra.mxu1 %vm99_vm0, %v210_v17 }
 0x119   :  { %387 = vmatmul.msk.f32.vlgmr.msra.gmra.mxu1 %vm99_vm0, %v127_v13 }
 0x11a   :  { %342 = vmatpush.msrb.mxu1 %v319_v40 }
 0x11c   :  { %343 = vmatpush.msrb.mxu1 %v318_v41 }
 0x11d   :  { %v265_v18 = vpop.permute.xlu0 %264 }
 0x11e   :  { %285 = vmatpush.msra.mxu2 %v265_v18  ;;  %344 = vmatpush.msrb.mxu1 %v317_v42 }
 0x120   :  { %345 = vmatpush.msrb.mxu1 %v316_v43 }
 0x194   :  { %v205_v20 = vpop.f32.mrf.mxu3 }
 0x195   :  { %v235_v21 = vmul.f32 0.17677669, %v205_v20 }
 0x196   :  { %v232_v22 = vpop.f32.mrf.mxu1 }
 0x197   :  { %v239_v24 = vsel %vm237_vm3, -1e+09, %v235_v21  ;;  %v236_v26 = vmul.f32 0.17677669, %v232_v22 }
 0x198   :  { %v242_v25 = vsel %vm241_vm4, %v239_v24, -inf }
 0x199   :  { %243 = vmax.xlane.f32.xlu1 %v242_v25  ;;  %v240_v27 = vsel %vm238_vm5, -1e+09, %v236_v26 }
 0x19a   :  { %v245_v28 = vsel %vm241_vm4, %v240_v27, -inf }
 0x1a1   :  { %246 = vmax.xlane.f32.xlu1 %v245_v28 }
 0x1ba   :  { %290 = vrot.lane.b32.xlu1 %v127_v13, %s548_s18 }
 0x20c   :  { %v244_v29 = vpop.xlane.xlu1 %243 }
 0x20d   :  { %v248_v30 = vsub.f32 %v239_v24, %v244_v29 }
 0x20f   :  { %v250_v31 = vmul.f32 1.442695, %v248_v30 }
 0x211   :  { %404 = vpow2.f32 %v250_v31 }
 0x214   :  { %v247_v32 = vpop.xlane.xlu1 %246 }
 0x215   :  { %v249_v33 = vsub.f32 %v240_v27, %v247_v32 }
 0x217   :  { %v405_v34 = vpop.eup %404  ;;  %v252_v35 = vmul.f32 1.442695, %v249_v33 }
 0x218   :  { %v254_v36 = vsel %vm241_vm4, %v405_v34, 0.0 }
 0x219   :  { %406 = vpow2.f32 %v252_v35  ;;  %255 = vadd.xlane.f32.xlu2 %v254_v36 }
 0x21f   :  { %v407_v37 = vpop.eup %406 }
 0x220   :  { %v257_v38 = vsel %vm241_vm4, %v407_v37, 0.0 }
 0x221   :  { %258 = vadd.xlane.f32.xlu2 %v257_v38 }
 0x22c   :  { %v291_v39 = vpop.permute.xlu1 %290 }
 0x22d   :  { %311 = vmatpush.msrb.mxu3 %v291_v39 }
 0x28c   :  { %v256_v44 = vpop.xlane.xlu2 %255 }
 0x28d   :  { %408 = vrcp.f32 %v256_v44 }
 0x293   :  { %v409_v45 = vpop.eup %408 }
 0x294   :  { %v262_v46 = vmul.f32 %v409_v45, %v405_v34  ;;  %v259_v47 = vpop.xlane.xlu2 %258 }
 0x295   :  { %410 = vrcp.f32 %v259_v47 }
 0x296   :  { %388 = vmatmul.msk.f32.vlgmr.msra.gmra.mxu2 %vm241_vm4, %v262_v46 }
 0x29b   :  { %v411_v48 = vpop.eup %410 }
 0x29c   :  { %v263_v49 = vmul.f32 %v411_v48, %v407_v37 }
 0x29e   :  { %389 = vmatmul.msk.f32.vlgmr.msrb.gmra.mxu3 %vm241_vm4, %v263_v49 }
 0x319   :  { %v287_v50 = vpop.f32.mrf.mxu2 }
 0x31a   :  { %390 = vmatmul.msk.f32.vlgmr.msrb.gmra.mxu1 %vm99_vm0, %v287_v50 }
 0x321   :  { %v313_v51 = vpop.f32.mrf.mxu3 }
 0x322   :  { %391 = vmatmul.msk.f32.gmra.mxu1 %vm99_vm0, %v313_v51 }
 0x397   :  { %v347_v53 = vpop.f32.mrf.mxu1 }
 0x398   :  { %v348_v54 = vadd.f32 %v403_v52, %v347_v53 }
 0x39a   :  { %353 = vst.msk [vmem:[#allocation10] sm:$0xff] %vm99_vm0, %v348_v54 }
 0x39f   :  { %v350_v55 = vpop.f32.mrf.mxu1 }
 0x3a0   :  { %v351_v56 = vadd.f32 %v403_v52, %v350_v55 }
 0x3a2   :  { %354 = vst.msk [vmem:[#allocation10 + $0x8] sm:$0xff] %vm99_vm0, %v351_v56 }
 0x3a3   :  { %367 = dma.vmem_to_hbm [thread:$0]  %s360_s21, 256, %s362_s24, [#allocation4], %s541_s29, %s541_s29, %s542_s30  }
 0x3a4   :  { %538 = dma.done.wait [#allocation4], 256  }
 0x3a5   :  { %539 = vsyncadd [#allocation4], 4294967040 }
 0x3a6   :  { %372 = vsyncpa [#allocation3], 1 }
 0x3a7   :  { %373 = vsyncpa [#allocation6], 1 }
 0x3a8   :  { %374 = vsyncpa [#allocation9], 1 }
 0x3a9   :  { %375 = vsyncpa [#allocation4], 1 }

</bundles_post_ra>
